<compile_context>
chip_gen: v7x
topology: tpu7x:2x2x1
jax: 0.10.0
libtpu: 0.0.40
codegen_flags: <defaults>
</compile_context>

<pallas_src>
import functools

import jax
import jax.numpy as jnp
from jax.experimental import pallas as pl
from jax.experimental.pallas import tpu as pltpu

_LANES = 128
_MIB = 1024 * 1024

# Per-input-block byte caps.  Conservative enough for v7x (64 MiB physical /
# 32 MiB scoped VMEM) once double-buffered in+out blocks and the f32 up-cast
# temporaries are counted; large enough to sit near the HBM roofline plateau
# on v5e/v6e.
_ELEMWISE_BLOCK_BYTES = 4 * _MIB
_CHANNEL_BLOCK_BYTES = 2 * _MIB
_DEFAULT_VMEM_LIMIT = 32 * _MIB   # valid on every generation (v5e default: 16)
_MAX_VMEM_LIMIT = 64 * _MIB       # v7x physical VMEM per TensorCore


def _sublane_multiple(dtype):
    # dtype-aware packed sublane tiling: f32 -> 8, bf16 -> 16, int8/fp8 -> 32.
    return {4: 8, 2: 16, 1: 32}.get(jnp.dtype(dtype).itemsize, 8)


def _pick_tile(dim, bytes_per_unit, align, cap_bytes, min_steps=1):
    """Largest tile that is a multiple of `align` (or the whole dim, which is
    exempt from the (8,128) rule) with tile * bytes_per_unit <= cap_bytes,
    optionally capped so the grid axis gets >= `min_steps` steps (feeds both
    TensorCores on v7x)."""
    if dim <= align:
        return int(dim)
    tile = (cap_bytes // max(bytes_per_unit, 1)) // align * align
    tile = max(align, tile)
    if min_steps > 1:
        tile = min(tile, pl.cdiv(pl.cdiv(dim, min_steps), align) * align)
    return int(dim) if tile >= dim else int(tile)


def _buffering(block_bytes, f32_block_bytes, n_f32_temps):
    """VMEM budget: default double-buffering, or single-buffering + a raised
    scoped limit for very large channel counts (large-C guard)."""
    est_double = 4 * block_bytes + n_f32_temps * f32_block_bytes  # 2 bufs x (in+out)
    if est_double + 2 * _MIB <= _DEFAULT_VMEM_LIMIT:
        return {}, _DEFAULT_VMEM_LIMIT
    est_single = 2 * block_bytes + n_f32_temps * f32_block_bytes
    vmem = min(max(_DEFAULT_VMEM_LIMIT, est_single + 4 * _MIB), _MAX_VMEM_LIMIT)
    # TODO(synk): C so large that even a single-buffered minimal block exceeds
    # VMEM needs a C-tiled two-pass / online softmax (third 'arbitrary' axis).
    return {"pipeline_mode": pl.Buffered(1)}, vmem


# ----------------------------- Pallas kernels ------------------------------
# Channel-reduction kernels see blocks whose axis 0 is the (fully resident)
# channel axis.  Compute is kept in f32 (v5e has no bf16 VPU/EUP); the kernels
# are HBM-bandwidth bound anyway.

def _sigmoid_kernel(x_ref, o_ref):
    x = x_ref[...].astype(jnp.float32)
    o_ref[...] = jax.nn.sigmoid(x).astype(o_ref.dtype)


def _softmax_kernel(x_ref, o_ref):
    # softmax over the channel axis (NCHW dim=1 == block axis 0)
    x = x_ref[...].astype(jnp.float32)
    m = jnp.max(x, axis=0, keepdims=True)
    e = jnp.exp(x - m)
    s = jnp.sum(e, axis=0, keepdims=True)
    o_ref[...] = (e / s).astype(o_ref.dtype)   # exact division: HBM-bound, VPU has slack


def _logsoftmax_kernel(x_ref, o_ref):
    # log-softmax over the channel axis (NCHW dim=1 == block axis 0)
    x = x_ref[...].astype(jnp.float32)
    m = jnp.max(x, axis=0, keepdims=True)
    shifted = x - m
    lse = jnp.log(jnp.sum(jnp.exp(shifted), axis=0, keepdims=True))
    o_ref[...] = (shifted - lse).astype(o_ref.dtype)


# ------------------------------ dispatch paths ------------------------------

def _elementwise(x, n, c, hw, itemsize, sub):
    """Sigmoid: pure HBM streaming on a flat lane-dense view."""
    total = n * c * hw
    if total % _LANES == 0:
        rows, lane = total // _LANES, _LANES          # fully lane-dense
    else:
        rows, lane = n * c, hw                        # ragged: whole HW on lanes
    xr = x.reshape(rows, lane)

    row_bytes = lane * itemsize
    tile = _pick_tile(rows, row_bytes, sub, _ELEMWISE_BLOCK_BYTES, min_steps=2)
    block_bytes = tile * row_bytes
    spec_kw, vmem_limit = _buffering(block_bytes, tile * lane * 4, n_f32_temps=2)

    spec = pl.BlockSpec((tile, lane), lambda i: (i, 0), **spec_kw)
    return pl.pallas_call(
        _sigmoid_kernel,
        out_shape=jax.ShapeDtypeStruct(xr.shape, x.dtype),
        grid_spec=pltpu.PrefetchScalarGridSpec(
            num_scalar_prefetch=0,
            grid=(pl.cdiv(rows, tile),),
            in_specs=[spec],
            out_specs=spec,
        ),
        compiler_params=pltpu.CompilerParams(
            dimension_semantics=("parallel",),
            vmem_limit_bytes=vmem_limit,
        ),
    )(xr)


def _channel_softmax(x, name, n, c, hw, itemsize, sub):
    """softmax / logsoftmax over the channel axis; C fully resident per block."""
    kernel = _logsoftmax_kernel if name == "logsoftmax" else _softmax_kernel
    min_steps = 2 if n == 1 else 1

    dense_min_block = c * sub * _LANES * itemsize
    if hw % _LANES == 0 and dense_min_block <= _CHANNEL_BLOCK_BYTES:
        # Lane+sublane dense layout: (N, C, rows, 128).  Free reshape, no pad.
        rows = hw // _LANES
        xr = x.reshape(n, c, rows, _LANES)
        row_bytes = c * _LANES * itemsize
        tile = _pick_tile(rows, row_bytes, sub, _CHANNEL_BLOCK_BYTES, min_steps)
        block_shape = (pl.Squeezed(), c, tile, _LANES)
        index_map = lambda i, t: (i, 0, t, 0)
        grid = (n, pl.cdiv(rows, tile))
        block_elems = c * tile * _LANES
    else:
        # Ragged HW and/or very large C: (N, C, HW), HW tiled in 128-lane
        # multiples (masked edge block) or taken whole; C sits on sublanes.
        xr = x.reshape(n, c, hw)
        col_bytes = c * itemsize
        tile = _pick_tile(hw, col_bytes, _LANES, _CHANNEL_BLOCK_BYTES, min_steps)
        block_shape = (pl.Squeezed(), c, tile)
        index_map = lambda i, t: (i, 0, t)
        grid = (n, pl.cdiv(hw, tile))
        block_elems = c * tile

    block_bytes = block_elems * itemsize
    spec_kw, vmem_limit = _buffering(block_bytes, block_elems * 4, n_f32_temps=3)

    spec = pl.BlockSpec(block_shape, index_map, **spec_kw)
    return pl.pallas_call(
        kernel,
        out_shape=jax.ShapeDtypeStruct(xr.shape, x.dtype),
        grid_spec=pltpu.PrefetchScalarGridSpec(
            num_scalar_prefetch=0,
            grid=grid,
            in_specs=[spec],
            out_specs=spec,
        ),
        compiler_params=pltpu.CompilerParams(
            dimension_semantics=("parallel", "parallel"),
            vmem_limit_bytes=vmem_limit,
        ),
    )(xr)


# ------------------------------ Python wrapper ------------------------------

@functools.partial(jax.jit, static_argnames=("name",))
def _activation_impl(x, name):
    orig_shape = x.shape
    n, c = orig_shape[0], orig_shape[1]
    hw = 1
    for d in orig_shape[2:]:
        hw *= int(d)
    itemsize = jnp.dtype(x.dtype).itemsize
    sub = _sublane_multiple(x.dtype)

    if name == "sigmoid":
        out = _elementwise(x, n, c, hw, itemsize, sub)
    else:
        # "softmax" (nn.Softmax() on 4-D NCHW picks dim=1), "softmax2d",
        # "logsoftmax" all reduce over the channel axis.
        out = _channel_softmax(x, name, n, c, hw, itemsize, sub)
    return out.reshape(orig_shape)


def activation(x, name="identity"):
    """Pallas-TPU equivalent of the PyTorch `Activation` module forward.

    x: (N, C, *spatial) array.  Softmax-style activations reduce over C (dim=1).
    """
    if name is None or name == "identity":
        # nn.Identity: return the input directly -- a copy kernel would cost
        # 2x the array size in HBM traffic for nothing.
        return x
    if callable(name):
        # TODO(synk): the `callable(name)` branch of the PyTorch module
        # (arbitrary user-supplied activation class) has no generic Pallas
        # equivalent.
        raise NotImplementedError("callable activations are not supported")
    if name not in ("sigmoid", "softmax", "softmax2d", "logsoftmax"):
        raise ValueError(
            "Activation should be sigmoid/softmax/softmax2d/logsoftmax/identity/None; "
            "got {}".format(name))
    return _activation_impl(x, name)


# ---------------------------------- main ------------------------------------

if __name__ == "__main__":
    key = jax.random.PRNGKey(0)
    N, C, H, W = 2, 4, 16, 16
    x = jax.random.normal(key, (N, C, H, W), dtype=jnp.float32)

    refs = {
        "identity": x,
        "sigmoid": jax.nn.sigmoid(x),
        "softmax2d": jax.nn.softmax(x, axis=1),
        "softmax": jax.nn.softmax(x, axis=1),
        "logsoftmax": jax.nn.log_softmax(x, axis=1),
    }
    for name, ref in refs.items():
        out = jax.block_until_ready(activation(x, name=name))
        assert out.shape == x.shape and out.dtype == x.dtype, name
        assert jnp.allclose(out, ref, atol=1e-5, rtol=1e-5), name

    # Ragged spatial extent (HW not a multiple of 128): exercises the
    # no-pad / masked-edge-block path.
    y = jax.random.normal(jax.random.PRNGKey(0), (1, 3, 15, 15), dtype=jnp.float32)
    ragged_refs = (
        ("sigmoid", jax.nn.sigmoid(y)),
        ("softmax2d", jax.nn.softmax(y, axis=1)),
        ("logsoftmax", jax.nn.log_softmax(y, axis=1)),
    )
    for name, ref in ragged_refs:
        out = jax.block_until_ready(activation(y, name=name))
        assert out.shape == y.shape and out.dtype == y.dtype, name
        assert jnp.allclose(out, ref, atol=1e-5, rtol=1e-5), name

    print("KERNEL_OK")
</pallas_src>

<mosaic_0001>
module attributes {stable_mosaic.version = 11 : i64} {
  func.func @_sigmoid_kernel(%arg0: i32, %arg1: memref<8x128xf32, #tpu.memory_space<vmem>>, %arg2: memref<8x128xf32, #tpu.memory_space<vmem>>) attributes {dimension_semantics = [#tpu.dimension_semantics<parallel>], iteration_bounds = array<i64: 2>, scalar_prefetch = 0 : i64, scratch_operands = 0 : i64, tpu.core_type = #tpu.core_type<tc>, window_params = [{transform_indices = @transform_0, window_bounds = array<i64: 8, 128>}, {transform_indices = @transform_1, window_bounds = array<i64: 8, 128>}]} {
    %c0 = arith.constant 0 : index
    %c0_0 = arith.constant 0 : index
    %0 = vector.load %arg1[%c0, %c0_0] : memref<8x128xf32, #tpu.memory_space<vmem>>, vector<8x128xf32>
    %1 = arith.negf %0 : vector<8x128xf32>
    %2 = math.exp %1 : vector<8x128xf32>
    %cst = arith.constant 1.000000e+00 : f32
    %3 = vector.broadcast %cst : f32 to vector<8x128xf32>
    %4 = arith.addf %3, %2 : vector<8x128xf32>
    %5 = arith.divf %3, %4 : vector<8x128xf32>
    %c0_1 = arith.constant 0 : index
    %c0_2 = arith.constant 0 : index
    %6 = vector.load %arg2[%c0_1, %c0_2] : memref<8x128xf32, #tpu.memory_space<vmem>>, vector<8x128xf32>
    tpu.vector_store %arg2[%c0_1, %c0_2], %5 {strides = array<i32>} : memref<8x128xf32, #tpu.memory_space<vmem>>, vector<8x128xf32>,
    return
  }
  func.func @transform_0(%arg0: i32) -> (i32, i32) {
    %c0_i32 = arith.constant 0 : i32
    %c0_i32_0 = arith.constant 0 : i32
    return %arg0, %c0_i32 : i32, i32
  }
  func.func @transform_1(%arg0: i32) -> (i32, i32) {
    %c0_i32 = arith.constant 0 : i32
    %c0_i32_0 = arith.constant 0 : i32
    return %arg0, %c0_i32 : i32, i32
  }
}

</mosaic_0001>

<bundles_post_ra>
// kernel: _activation_impl.1
= control target key start
LH: loop header
LB: loop body
LE: loop exit
PB: predicated region body
PF: predicated region fallthrough
CT: control target
= control target key end

     0   :  { %s199_s6 = smov 0   ;;  %s219_s0 = inlined_call_operand.vmem [shape: f32[16,128], index: 0, kind: input, shape index: {}]   ;;  %s220_s1 = inlined_call_operand.vmem [shape: f32[16,128], index: 1, kind: output, shape index: {}]  }
   0x1 LB: > { %s173_s7 = sadd.s32 4294967295, %s201_s6   ;;  %p177_p0 = scmp.ge.s32.totalorder %s201_s6, 1  ;;  %s201_s6 = sphi %s199_s6, %s11_s6  }
   0x2   : > { %p86_p1 = scmp.lt.s32.totalorder %s201_s6, 3 }
   0x4   : > { %p87_p2 = pnand %p177_p0, %p86_p1 }
   0x5   : > { %p104_p3 = scmp.lt.s32.totalorder (!%p87_p2), %s173_s7, 1 }
   0x6   : > { %90 = sbr.rel (%p87_p2) target bundleno = 44 (0x2c), region = 24 }
   0xd   : > { %s222_s7 = smov (!%p104_p3, %s173_s7), 1 }
   0xe   : > { %s178_s8 = sshll.u32 %s222_s7, 3 }
   0xf   : > { %s107_s11 = scalar_lea.vmem %s219_s0, %s178_s8  ;;  %s111_s14 = scalar_lea.vmem %s220_s1, %s178_s8 }
  0x10   : > { %v112_v0 = vld [vmem:[%s107_s11] sm:$0xff] }
  0x11   : > { %v180_v1 = vmul.f32 -1.442695, %v112_v0 }
  0x13   : > { %191 = vpow2.f32 %v180_v1 }
  0x1d   : > { %v192_v2 = vpop.eup %191 }
  0x1e   : > { %v116_v3 = vadd.f32 1.0, %v192_v2 }
  0x20   : > { %193 = vrcp.f32 %v116_v3 }
  0x2a   : > { %v194_v4 = vpop.eup %193 }
  0x2b   : > { %119 = vst [vmem:[%s111_s14] sm:$0xff] %v194_v4 }
  0x2c PF: > { %s11_s6 = sadd.s32 1, %s201_s6  }
  0x2d   : > { %p8_p4 = scmp.ge.s32.totalorder %s11_s6, 4  }
  0x2f   :  { %10 = sbr.rel (!%p8_p4) target bundleno = 1 (0x1), region = 54 }

</bundles_post_ra>
